<compile_context>
chip_gen: v5e
topology: v5e:2x2
jax: 0.10.0
libtpu: 0.0.40
codegen_flags: <defaults>
</compile_context>

<pallas_src>
import math

import jax
import jax.numpy as jnp
from jax.experimental import pallas as pl
from jax.experimental.pallas import tpu as pltpu

# ----------------------------- configuration --------------------------------
N = 2          # batch
IN_CH = 4      # in_channels
OUT_CH = 8     # out_channels
W_DIM = 32     # w_dim
RES = 16       # resolution (input spatial is RES//2)
IMG_CH = 3     # img_channels
LRELU_ALPHA = 0.2
LRELU_GAIN = math.sqrt(2.0)
P = RES * RES  # flattened output spatial (lane-dense dim)


# ------------------------------ Pallas kernel --------------------------------
def _fused_block_kernel(p0t_ref, w0f_ref, b0_ref, w1f_ref, b1_ref,
                        imgpt_ref, wfir_ref, w2f_ref, brgb_ref,
                        x_out_ref, img_out_ref):
    """Whole synthesis block for one sample.  All tensors are [channels, P=256]
    (channels on sublanes, flattened 16x16 spatial on lanes)."""

    # ---- conv0: modulated up=2 conv (transposed-conv + FIR + demod are folded
    #      into the per-sample weight w0f), bias, leaky-ReLU ------------------
    x0 = jnp.dot(w0f_ref[0], p0t_ref[0], preferred_element_type=jnp.float32)
    x0 = x0 + b0_ref[...]
    x0 = jnp.where(x0 >= 0.0, x0, LRELU_ALPHA * x0) * LRELU_GAIN       # [8, 256]

    # ---- conv1: 3x3 same-pad conv computed fully in VMEM --------------------
    # x0 is [C, P] with p = y*16 + x.  Build the 9 shifted taps from a
    # zero-padded flat row using static lane slices; mask row-wrap positions.
    zpad = jnp.zeros((OUT_CH, RES + 1), jnp.float32)                   # 17 zeros
    x0p = jnp.concatenate([zpad, x0, zpad], axis=1)                    # [8, 290]
    # x coordinate of every lane (RES is a power of two -> use AND, not rem).
    xcoord = jnp.bitwise_and(
        jax.lax.broadcasted_iota(jnp.int32, (OUT_CH, P), 1), RES - 1)
    mask_l = xcoord >= 1           # source column x-1 is valid
    mask_r = xcoord <= RES - 2     # source column x+1 is valid
    taps = []
    for dy in (-1, 0, 1):
        for dx in (-1, 0, 1):
            start = (RES + 1) + dy * RES + dx
            sl = x0p[:, start:start + P]
            if dx == -1:
                sl = jnp.where(mask_l, sl, 0.0)
            elif dx == 1:
                sl = jnp.where(mask_r, sl, 0.0)
            taps.append(sl)
    stack = jnp.concatenate(taps, axis=0)                              # [72, 256]
    x1 = jnp.dot(w1f_ref[0], stack, preferred_element_type=jnp.float32)
    x1 = x1 + b1_ref[...]
    x1 = jnp.where(x1 >= 0.0, x1, LRELU_ALPHA * x1) * LRELU_GAIN       # [8, 256]
    x_out_ref[0] = x1

    # ---- skip branch: img upsample (depthwise 4x4 FIR as a small matmul) ----
    img_up = jnp.dot(wfir_ref[...], imgpt_ref[0],
                     preferred_element_type=jnp.float32)               # [3, 256]

    # ---- torgb: modulated 1x1 conv (no demod) + bias, fused img.add_() ------
    rgb = jnp.dot(w2f_ref[0], x1, preferred_element_type=jnp.float32)  # [3, 256]
    img_out_ref[0] = img_up + rgb + brgb_ref[...]


def fused_block(p0t, w0f, b0, w1f, b1, imgpt, wfir, w2f, brgb):
    n = p0t.shape[0]
    return pl.pallas_call(
        _fused_block_kernel,
        out_shape=(jax.ShapeDtypeStruct((n, OUT_CH, P), jnp.float32),
                   jax.ShapeDtypeStruct((n, IMG_CH, P), jnp.float32)),
        grid=(n,),
        in_specs=[
            pl.BlockSpec((1, 36 * IN_CH, P), lambda i: (i, 0, 0)),     # conv0 patches^T
            pl.BlockSpec((1, OUT_CH, 36 * IN_CH), lambda i: (i, 0, 0)),  # folded W0
            pl.BlockSpec((OUT_CH, 1), lambda i: (0, 0)),               # b0
            pl.BlockSpec((1, OUT_CH, 9 * OUT_CH), lambda i: (i, 0, 0)),  # folded W1
            pl.BlockSpec((OUT_CH, 1), lambda i: (0, 0)),               # b1
            pl.BlockSpec((1, 16 * IMG_CH, P), lambda i: (i, 0, 0)),    # img FIR patches^T
            pl.BlockSpec((IMG_CH, 16 * IMG_CH), lambda i: (0, 0)),     # depthwise FIR mat
            pl.BlockSpec((1, IMG_CH, OUT_CH), lambda i: (i, 0, 0)),    # folded torgb W
            pl.BlockSpec((IMG_CH, 1), lambda i: (0, 0)),               # rgb bias
        ],
        out_specs=(pl.BlockSpec((1, OUT_CH, P), lambda i: (i, 0, 0)),
                   pl.BlockSpec((1, IMG_CH, P), lambda i: (i, 0, 0))),
        compiler_params=pltpu.CompilerParams(
            dimension_semantics=("parallel",)),   # one sample per TC on v7x
    )(p0t, w0f, b0, w1f, b1, imgpt, wfir, w2f, brgb)


# ------------------------------ XLA-side prep ---------------------------------
def compose_up_weight(weight, f4):
    """Compose stride-2 transposed 3x3 conv + 4x4 FIR (gain 4) into one 6x6
    correlation kernel acting on the zero-dilated, pad-3 input."""
    a = weight[:, :, ::-1, ::-1]                          # spatial flip
    o, i = weight.shape[:2]
    weff = jnp.zeros((o, i, 6, 6), weight.dtype)
    for qy in range(3):
        for qx in range(3):
            weff = weff.at[:, :, qy:qy + 4, qx:qx + 4].add(
                a[:, :, qy:qy + 1, qx:qx + 1] * (f4 * 4.0))
    return weff


def _styles_and_demod(ws, p):
    """One batched einsum for the 3 affine layers + demod coefficients."""
    inv = 1.0 / math.sqrt(W_DIM)
    a0 = jnp.pad(p['conv0_aff_w'], ((0, OUT_CH - IN_CH), (0, 0)))
    b0 = jnp.pad(p['conv0_aff_b'], ((0, OUT_CH - IN_CH),))
    aff_w = jnp.stack([a0, p['conv1_aff_w'], p['rgb_aff_w']], axis=0) * inv
    aff_b = jnp.stack([b0, p['conv1_aff_b'], p['rgb_aff_b']], axis=0)
    styles = jnp.einsum('nlw,lkw->nlk', ws, aff_w) + aff_b[None]       # [N,3,8]
    s0 = styles[:, 0, :IN_CH]
    s1 = styles[:, 1]
    s2 = styles[:, 2] * (1.0 / math.sqrt(OUT_CH))                      # ToRGB weight_gain
    wsq0 = jnp.sum(jnp.square(p['conv0_w']), axis=(2, 3))              # [O,I]
    wsq1 = jnp.sum(jnp.square(p['conv1_w']), axis=(2, 3))
    d0 = jax.lax.rsqrt(jnp.einsum('ni,oi->no', jnp.square(s0), wsq0) + 1e-8)
    d1 = jax.lax.rsqrt(jnp.einsum('ni,oi->no', jnp.square(s1), wsq1) + 1e-8)
    return s0, s1, s2, d0, d1


def conv0_patches_T(x_nchw):
    """x [N,C,8,8] -> transposed im2col [N, 36*C, 256] for the composed 6x6
    correlation on the zero-dilated (stride-2 transposed conv), pad-3 input."""
    n, c, h, w = x_nchw.shape
    xd = jnp.zeros((n, c, 2 * h - 1, 2 * w - 1), x_nchw.dtype)
    xd = xd.at[:, :, ::2, ::2].set(x_nchw)
    xdp = jnp.pad(xd, ((0, 0), (0, 0), (3, 3), (3, 3)))                # [N,C,21,21]
    taps = [xdp[:, :, ky:ky + RES, kx:kx + RES]
            for ky in range(6) for kx in range(6)]
    pt = jnp.stack(taps, axis=1)                                       # [N,36,C,16,16]
    return pt.reshape(n, 36 * c, P)


def img_patches_T(img_nchw):
    """img [N,3,8,8] -> transposed im2col [N, 16*3, 256] for upfirdn2d up=2:
    zero-insert, pad (2,1), 4x4 FIR window."""
    n, c, h, w = img_nchw.shape
    xd = jnp.zeros((n, c, 2 * h, 2 * w), img_nchw.dtype)
    xd = xd.at[:, :, ::2, ::2].set(img_nchw)
    xdp = jnp.pad(xd, ((0, 0), (0, 0), (2, 1), (2, 1)))                # [N,3,19,19]
    taps = [xdp[:, :, ky:ky + RES, kx:kx + RES]
            for ky in range(4) for kx in range(4)]
    pt = jnp.stack(taps, axis=1)                                       # [N,16,3,16,16]
    return pt.reshape(n, 16 * c, P)


# ------------------------------ parameter init --------------------------------
def init_params(key):
    ks = jax.random.split(key, 6)
    p = {
        # conv0: SynthesisLayer(in_ch -> out_ch, up=2, kernel=3)
        'conv0_aff_w': jax.random.normal(ks[0], (IN_CH, W_DIM), jnp.float32),
        'conv0_aff_b': jnp.ones((IN_CH,), jnp.float32),          # bias_init=1
        'conv0_w': jax.random.normal(ks[1], (OUT_CH, IN_CH, 3, 3), jnp.float32),
        'conv0_b': jnp.zeros((OUT_CH,), jnp.float32),
        # conv1: SynthesisLayer(out_ch -> out_ch, kernel=3)
        'conv1_aff_w': jax.random.normal(ks[2], (OUT_CH, W_DIM), jnp.float32),
        'conv1_aff_b': jnp.ones((OUT_CH,), jnp.float32),
        'conv1_w': jax.random.normal(ks[3], (OUT_CH, OUT_CH, 3, 3), jnp.float32),
        'conv1_b': jnp.zeros((OUT_CH,), jnp.float32),
        # torgb: ToRGBLayer(out_ch -> img_ch, kernel=1, demodulate=False)
        'rgb_aff_w': jax.random.normal(ks[4], (OUT_CH, W_DIM), jnp.float32),
        'rgb_aff_b': jnp.ones((OUT_CH,), jnp.float32),
        'rgb_w': jax.random.normal(ks[5], (IMG_CH, OUT_CH, 1, 1), jnp.float32),
        'rgb_b': jnp.zeros((IMG_CH,), jnp.float32),
    }
    f = jnp.array([1.0, 3.0, 3.0, 1.0], jnp.float32)
    f2 = jnp.outer(f, f)
    p['fir'] = f2 / jnp.sum(f2)                                  # setup_filter
    return p


# ------------------------------ block forward --------------------------------
def synthesis_block_forward(x, img, ws, p):
    """x [N,4,8,8], img [N,3,8,8], ws [N,3,32] -> (x1 [N,8,16,16], img [N,3,16,16])."""
    n = ws.shape[0]
    x = x.astype(jnp.float32)
    img = img.astype(jnp.float32)
    ws = ws.astype(jnp.float32)

    s0, s1, s2, d0, d1 = _styles_and_demod(ws, p)

    # Fold styles + demod into tiny per-sample weight matrices (lane-dense [Co,K]).
    weff = compose_up_weight(p['conv0_w'], p['fir'])                    # [8,4,6,6]
    w0T = jnp.transpose(weff, (0, 2, 3, 1)).reshape(OUT_CH, 36 * IN_CH)
    w0f = d0[:, :, None] * w0T[None] * jnp.tile(s0, (1, 36))[:, None, :]   # [N,8,144]
    w1T = jnp.transpose(p['conv1_w'], (0, 2, 3, 1)).reshape(OUT_CH, 9 * OUT_CH)
    w1f = d1[:, :, None] * w1T[None] * jnp.tile(s1, (1, 9))[:, None, :]    # [N,8,72]
    w2f = p['rgb_w'].reshape(IMG_CH, OUT_CH)[None] * s2[:, None, :]        # [N,3,8]
    wfir = jnp.kron((p['fir'] * 4.0).reshape(1, 16),
                    jnp.eye(IMG_CH, dtype=jnp.float32))                    # [3,48]

    p0t = conv0_patches_T(x)                                               # [N,144,256]
    imgpt = img_patches_T(img)                                             # [N,48,256]

    b0 = p['conv0_b'].reshape(OUT_CH, 1)
    b1 = p['conv1_b'].reshape(OUT_CH, 1)
    brgb = p['rgb_b'].reshape(IMG_CH, 1)

    x1t, imgt = fused_block(p0t, w0f, b0, w1f, b1, imgpt, wfir, w2f, brgb)
    # [N, C, 256] with p = y*16 + x  ->  NCHW by a pure reshape (no transpose).
    return (x1t.reshape(n, OUT_CH, RES, RES),
            imgt.reshape(n, IMG_CH, RES, RES))


# ------------------------- pure-XLA reference (for check) ---------------------
def reference_forward(x, img, ws, p):
    lrelu = lambda v: jnp.where(v >= 0.0, v, LRELU_ALPHA * v)
    dn = ('NCHW', 'OIHW', 'NCHW')
    hi = jax.lax.Precision.HIGHEST
    s0, s1, s2, d0, d1 = _styles_and_demod(ws, p)
    weff = compose_up_weight(p['conv0_w'], p['fir'])
    y0 = jax.lax.conv_general_dilated(
        x * s0[:, :, None, None], weff, (1, 1), padding=[(3, 3), (3, 3)],
        lhs_dilation=(2, 2), dimension_numbers=dn, precision=hi)
    y0 = lrelu(y0 * d0[:, :, None, None] + p['conv0_b'][None, :, None, None]) * LRELU_GAIN
    y1 = jax.lax.conv_general_dilated(
        y0 * s1[:, :, None, None], p['conv1_w'], (1, 1),
        padding=[(1, 1), (1, 1)], dimension_numbers=dn, precision=hi)
    y1 = lrelu(y1 * d1[:, :, None, None] + p['conv1_b'][None, :, None, None]) * LRELU_GAIN
    wf = jnp.tile((p['fir'] * 4.0)[None, None], (IMG_CH, 1, 1, 1))
    img_up = jax.lax.conv_general_dilated(
        img, wf, (1, 1), padding=[(2, 2), (2, 2)], lhs_dilation=(2, 2),
        feature_group_count=IMG_CH, dimension_numbers=dn, precision=hi)
    rgb = jax.lax.conv_general_dilated(
        y1 * s2[:, :, None, None], p['rgb_w'], (1, 1),
        padding=[(0, 0), (0, 0)], dimension_numbers=dn, precision=hi)
    rgb = rgb + p['rgb_b'][None, :, None, None]
    return y1, img_up + rgb


# ----------------------------------- main -------------------------------------
if __name__ == "__main__":
    key = jax.random.PRNGKey(0)
    kp, kx, kw, ki = jax.random.split(key, 4)
    params = init_params(kp)

    x_in = jax.random.normal(kx, (N, IN_CH, RES // 2, RES // 2), jnp.float32)
    ws_in = jax.random.normal(kw, (N, 3, W_DIM), jnp.float32)  # num_conv+num_torgb = 3
    img_in = jax.random.normal(ki, (N, IMG_CH, RES // 2, RES // 2), jnp.float32)

    fwd = jax.jit(lambda a, b, c: synthesis_block_forward(a, b, c, params))
    x_out, img_out = fwd(x_in, img_in, ws_in)
    jax.block_until_ready((x_out, img_out))

    assert x_out.shape == (N, OUT_CH, RES, RES) and x_out.dtype == jnp.float32
    assert img_out.shape == (N, IMG_CH, RES, RES) and img_out.dtype == jnp.float32
    assert bool(jnp.all(jnp.isfinite(x_out))) and bool(jnp.all(jnp.isfinite(img_out)))

    # Correctness check against a plain-XLA (lax.conv) reference.
    ref = jax.jit(lambda a, b, c: reference_forward(a, b, c, params))
    x_ref, img_ref = ref(x_in, img_in, ws_in)
    jax.block_until_ready((x_ref, img_ref))
    tol_x = 2e-2 * (1.0 + float(jnp.max(jnp.abs(x_ref))))
    tol_i = 2e-2 * (1.0 + float(jnp.max(jnp.abs(img_ref))))
    assert float(jnp.max(jnp.abs(x_out - x_ref))) <= tol_x, "x mismatch vs reference"
    assert float(jnp.max(jnp.abs(img_out - img_ref))) <= tol_i, "img mismatch vs reference"

    print("KERNEL_OK")
</pallas_src>

<mosaic_0001>
module attributes {stable_mosaic.version = 11 : i64} {
  func.func @_fused_block_kernel(%arg0: i32, %arg1: memref<1x144x256xf32, #tpu.memory_space<vmem>>, %arg2: memref<1x8x144xf32, #tpu.memory_space<vmem>>, %arg3: memref<8x1xf32, #tpu.memory_space<vmem>>, %arg4: memref<1x8x72xf32, #tpu.memory_space<vmem>>, %arg5: memref<8x1xf32, #tpu.memory_space<vmem>>, %arg6: memref<1x48x256xf32, #tpu.memory_space<vmem>>, %arg7: memref<3x48xf32, #tpu.memory_space<vmem>>, %arg8: memref<1x3x8xf32, #tpu.memory_space<vmem>>, %arg9: memref<3x1xf32, #tpu.memory_space<vmem>>, %arg10: memref<1x8x256xf32, #tpu.memory_space<vmem>>, %arg11: memref<1x3x256xf32, #tpu.memory_space<vmem>>) attributes {dimension_semantics = [#tpu.dimension_semantics<parallel>], iteration_bounds = array<i64: 2>, scalar_prefetch = 0 : i64, scratch_operands = 0 : i64, tpu.core_type = #tpu.core_type<tc>, window_params = [{transform_indices = @transform_0, window_bounds = array<i64: 1, 144, 256>}, {transform_indices = @transform_1, window_bounds = array<i64: 1, 8, 144>}, {pipeline_mode = #tpu.pipeline_mode<synchronous>, transform_indices = @transform_2, window_bounds = array<i64: 8, 1>}, {transform_indices = @transform_3, window_bounds = array<i64: 1, 8, 72>}, {pipeline_mode = #tpu.pipeline_mode<synchronous>, transform_indices = @transform_4, window_bounds = array<i64: 8, 1>}, {transform_indices = @transform_5, window_bounds = array<i64: 1, 48, 256>}, {pipeline_mode = #tpu.pipeline_mode<synchronous>, transform_indices = @transform_6, window_bounds = array<i64: 3, 48>}, {transform_indices = @transform_7, window_bounds = array<i64: 1, 3, 8>}, {pipeline_mode = #tpu.pipeline_mode<synchronous>, transform_indices = @transform_8, window_bounds = array<i64: 3, 1>}, {transform_indices = @transform_9, window_bounds = array<i64: 1, 8, 256>}, {transform_indices = @transform_10, window_bounds = array<i64: 1, 3, 256>}]} {
    %c0 = arith.constant 0 : index
    %c0_0 = arith.constant 0 : index
    %c0_1 = arith.constant 0 : index
    %0 = vector.load %arg2[%c0, %c0_0, %c0_1] : memref<1x8x144xf32, #tpu.memory_space<vmem>>, vector<1x8x144xf32>
    %1 = vector.shape_cast %0 : vector<1x8x144xf32> to vector<8x144xf32>
    %c0_2 = arith.constant 0 : index
    %c0_3 = arith.constant 0 : index
    %c0_4 = arith.constant 0 : index
    %2 = vector.load %arg1[%c0_2, %c0_3, %c0_4] : memref<1x144x256xf32, #tpu.memory_space<vmem>>, vector<1x144x256xf32>
    %3 = vector.shape_cast %2 : vector<1x144x256xf32> to vector<144x256xf32>
    %cst = arith.constant dense<0.000000e+00> : vector<8x256xf32>
    %4 = tpu.matmul %1, %3, %cst {dimension_numbers = #tpu.dot_dimension_numbers<[1], [0], [0], [1], [0, 0, 1, 1], [], []>} : vector<8x144xf32>, vector<144x256xf32>, vector<8x256xf32> -> vector<8x256xf32>
    %c0_5 = arith.constant 0 : index
    %c0_6 = arith.constant 0 : index
    %5 = vector.load %arg3[%c0_5, %c0_6] : memref<8x1xf32, #tpu.memory_space<vmem>>, vector<8x1xf32>
    %6 = vector.broadcast %5 : vector<8x1xf32> to vector<8x256xf32>
    %7 = arith.addf %4, %6 : vector<8x256xf32>
    %cst_7 = arith.constant 0.000000e+00 : f32
    %8 = vector.broadcast %cst_7 : f32 to vector<8x256xf32>
    %9 = arith.cmpf oge, %7, %8 : vector<8x256xf32>
    %cst_8 = arith.constant 2.000000e-01 : f32
    %10 = vector.broadcast %cst_8 : f32 to vector<8x256xf32>
    %11 = arith.mulf %10, %7 : vector<8x256xf32>
    %12 = arith.select %9, %7, %11 : vector<8x256xi1>, vector<8x256xf32>
    %cst_9 = arith.constant 1.41421354 : f32
    %13 = vector.broadcast %cst_9 : f32 to vector<8x256xf32>
    %14 = arith.mulf %12, %13 : vector<8x256xf32>
    %cst_10 = arith.constant 0.000000e+00 : f32
    %15 = vector.broadcast %cst_10 : f32 to vector<8x17xf32>
    %16 = tpu.concatenate %15, %14, %15 in 1 : vector<8x17xf32>, vector<8x256xf32>, vector<8x17xf32> -> vector<8x290xf32>
    %17 = tpu.iota {dimensions = array<i32: 1>} : vector<8x256xi32>
    %c15_i32 = arith.constant 15 : i32
    %18 = vector.broadcast %c15_i32 : i32 to vector<8x256xi32>
    %19 = arith.andi %17, %18 : vector<8x256xi32>
    %c1_i32 = arith.constant 1 : i32
    %20 = vector.broadcast %c1_i32 : i32 to vector<8x256xi32>
    %21 = arith.cmpi sge, %19, %20 : vector<8x256xi32>
    %c14_i32 = arith.constant 14 : i32
    %22 = vector.broadcast %c14_i32 : i32 to vector<8x256xi32>
    %23 = arith.cmpi sle, %19, %22 : vector<8x256xi32>
    %24 = vector.extract_strided_slice %16 {offsets = [0, 0], sizes = [8, 256], strides = [1, 1]} : vector<8x290xf32> to vector<8x256xf32>
    %cst_11 = arith.constant 0.000000e+00 : f32
    %25 = vector.broadcast %cst_11 : f32 to vector<8x256xf32>
    %26 = arith.select %21, %24, %25 : vector<8x256xi1>, vector<8x256xf32>
    %27 = vector.extract_strided_slice %16 {offsets = [0, 1], sizes = [8, 256], strides = [1, 1]} : vector<8x290xf32> to vector<8x256xf32>
    %28 = vector.extract_strided_slice %16 {offsets = [0, 2], sizes = [8, 256], strides = [1, 1]} : vector<8x290xf32> to vector<8x256xf32>
    %cst_12 = arith.constant 0.000000e+00 : f32
    %29 = vector.broadcast %cst_12 : f32 to vector<8x256xf32>
    %30 = arith.select %23, %28, %29 : vector<8x256xi1>, vector<8x256xf32>
    %31 = vector.extract_strided_slice %16 {offsets = [0, 16], sizes = [8, 256], strides = [1, 1]} : vector<8x290xf32> to vector<8x256xf32>
    %cst_13 = arith.constant 0.000000e+00 : f32
    %32 = vector.broadcast %cst_13 : f32 to vector<8x256xf32>
    %33 = arith.select %21, %31, %32 : vector<8x256xi1>, vector<8x256xf32>
    %34 = vector.extract_strided_slice %16 {offsets = [0, 17], sizes = [8, 256], strides = [1, 1]} : vector<8x290xf32> to vector<8x256xf32>
    %35 = vector.extract_strided_slice %16 {offsets = [0, 18], sizes = [8, 256], strides = [1, 1]} : vector<8x290xf32> to vector<8x256xf32>
    %cst_14 = arith.constant 0.000000e+00 : f32
    %36 = vector.broadcast %cst_14 : f32 to vector<8x256xf32>
    %37 = arith.select %23, %35, %36 : vector<8x256xi1>, vector<8x256xf32>
    %38 = vector.extract_strided_slice %16 {offsets = [0, 32], sizes = [8, 256], strides = [1, 1]} : vector<8x290xf32> to vector<8x256xf32>
    %cst_15 = arith.constant 0.000000e+00 : f32
    %39 = vector.broadcast %cst_15 : f32 to vector<8x256xf32>
    %40 = arith.select %21, %38, %39 : vector<8x256xi1>, vector<8x256xf32>
    %41 = vector.extract_strided_slice %16 {offsets = [0, 33], sizes = [8, 256], strides = [1, 1]} : vector<8x290xf32> to vector<8x256xf32>
    %42 = vector.extract_strided_slice %16 {offsets = [0, 34], sizes = [8, 256], strides = [1, 1]} : vector<8x290xf32> to vector<8x256xf32>
    %cst_16 = arith.constant 0.000000e+00 : f32
    %43 = vector.broadcast %cst_16 : f32 to vector<8x256xf32>
    %44 = arith.select %23, %42, %43 : vector<8x256xi1>, vector<8x256xf32>
    %45 = tpu.concatenate %26, %27, %30, %33, %34, %37, %40, %41, %44 in 0 : vector<8x256xf32>, vector<8x256xf32>, vector<8x256xf32>, vector<8x256xf32>, vector<8x256xf32>, vector<8x256xf32>, vector<8x256xf32>, vector<8x256xf32>, vector<8x256xf32> -> vector<72x256xf32>
    %c0_17 = arith.constant 0 : index
    %c0_18 = arith.constant 0 : index
    %c0_19 = arith.constant 0 : index
    %46 = vector.load %arg4[%c0_17, %c0_18, %c0_19] : memref<1x8x72xf32, #tpu.memory_space<vmem>>, vector<1x8x72xf32>
    %47 = vector.shape_cast %46 : vector<1x8x72xf32> to vector<8x72xf32>
    %cst_20 = arith.constant dense<0.000000e+00> : vector<8x256xf32>
    %48 = tpu.matmul %47, %45, %cst_20 {dimension_numbers = #tpu.dot_dimension_numbers<[1], [0], [0], [1], [0, 0, 1, 1], [], []>} : vector<8x72xf32>, vector<72x256xf32>, vector<8x256xf32> -> vector<8x256xf32>
    %c0_21 = arith.constant 0 : index
    %c0_22 = arith.constant 0 : index
    %49 = vector.load %arg5[%c0_21, %c0_22] : memref<8x1xf32, #tpu.memory_space<vmem>>, vector<8x1xf32>
    %50 = vector.broadcast %49 : vector<8x1xf32> to vector<8x256xf32>
    %51 = arith.addf %48, %50 : vector<8x256xf32>
    %cst_23 = arith.constant 0.000000e+00 : f32
    %52 = vector.broadcast %cst_23 : f32 to vector<8x256xf32>
    %53 = arith.cmpf oge, %51, %52 : vector<8x256xf32>
    %cst_24 = arith.constant 2.000000e-01 : f32
    %54 = vector.broadcast %cst_24 : f32 to vector<8x256xf32>
    %55 = arith.mulf %54, %51 : vector<8x256xf32>
    %56 = arith.select %53, %51, %55 : vector<8x256xi1>, vector<8x256xf32>
    %cst_25 = arith.constant 1.41421354 : f32
    %57 = vector.broadcast %cst_25 : f32 to vector<8x256xf32>
    %58 = arith.mulf %56, %57 : vector<8x256xf32>
    %c0_26 = arith.constant 0 : index
    %c0_27 = arith.constant 0 : index
    %c0_28 = arith.constant 0 : index
    %59 = vector.load %arg10[%c0_26, %c0_27, %c0_28] : memref<1x8x256xf32, #tpu.memory_space<vmem>>, vector<1x8x256xf32>
    %60 = vector.shape_cast %59 : vector<1x8x256xf32> to vector<8x256xf32>
    %61 = vector.shape_cast %58 : vector<8x256xf32> to vector<1x8x256xf32>
    tpu.vector_store %arg10[%c0_26, %c0_27, %c0_28], %61 {strides = array<i32>} : memref<1x8x256xf32, #tpu.memory_space<vmem>>, vector<1x8x256xf32>,
    %c0_29 = arith.constant 0 : index
    %c0_30 = arith.constant 0 : index
    %62 = vector.load %arg7[%c0_29, %c0_30] : memref<3x48xf32, #tpu.memory_space<vmem>>, vector<3x48xf32>
    %c0_31 = arith.constant 0 : index
    %c0_32 = arith.constant 0 : index
    %c0_33 = arith.constant 0 : index
    %63 = vector.load %arg6[%c0_31, %c0_32, %c0_33] : memref<1x48x256xf32, #tpu.memory_space<vmem>>, vector<1x48x256xf32>
    %64 = vector.shape_cast %63 : vector<1x48x256xf32> to vector<48x256xf32>
    %cst_34 = arith.constant dense<0.000000e+00> : vector<3x256xf32>
    %65 = tpu.matmul %62, %64, %cst_34 {dimension_numbers = #tpu.dot_dimension_numbers<[1], [0], [0], [1], [0, 0, 1, 1], [], []>} : vector<3x48xf32>, vector<48x256xf32>, vector<3x256xf32> -> vector<3x256xf32>
    %c0_35 = arith.constant 0 : index
    %c0_36 = arith.constant 0 : index
    %c0_37 = arith.constant 0 : index
    %66 = vector.load %arg8[%c0_35, %c0_36, %c0_37] : memref<1x3x8xf32, #tpu.memory_space<vmem>>, vector<1x3x8xf32>
    %67 = vector.shape_cast %66 : vector<1x3x8xf32> to vector<3x8xf32>
    %cst_38 = arith.constant dense<0.000000e+00> : vector<3x256xf32>
    %68 = tpu.matmul %67, %58, %cst_38 {dimension_numbers = #tpu.dot_dimension_numbers<[1], [0], [0], [1], [0, 0, 1, 1], [], []>} : vector<3x8xf32>, vector<8x256xf32>, vector<3x256xf32> -> vector<3x256xf32>
    %69 = arith.addf %65, %68 : vector<3x256xf32>
    %c0_39 = arith.constant 0 : index
    %c0_40 = arith.constant 0 : index
    %70 = vector.load %arg9[%c0_39, %c0_40] : memref<3x1xf32, #tpu.memory_space<vmem>>, vector<3x1xf32>
    %71 = vector.broadcast %70 : vector<3x1xf32> to vector<3x256xf32>
    %72 = arith.addf %69, %71 : vector<3x256xf32>
    %c0_41 = arith.constant 0 : index
    %c0_42 = arith.constant 0 : index
    %c0_43 = arith.constant 0 : index
    %73 = vector.load %arg11[%c0_41, %c0_42, %c0_43] : memref<1x3x256xf32, #tpu.memory_space<vmem>>, vector<1x3x256xf32>
    %74 = vector.shape_cast %73 : vector<1x3x256xf32> to vector<3x256xf32>
    %75 = vector.shape_cast %72 : vector<3x256xf32> to vector<1x3x256xf32>
    tpu.vector_store %arg11[%c0_41, %c0_42, %c0_43], %75 {strides = array<i32>} : memref<1x3x256xf32, #tpu.memory_space<vmem>>, vector<1x3x256xf32>,
    return
  }
  func.func @transform_0(%arg0: i32) -> (i32, i32, i32) {
    %c0_i32 = arith.constant 0 : i32
    %c0_i32_0 = arith.constant 0 : i32
    %c0_i32_1 = arith.constant 0 : i32
    return %arg0, %c0_i32, %c0_i32_0 : i32, i32, i32
  }
  func.func @transform_1(%arg0: i32) -> (i32, i32, i32) {
    %c0_i32 = arith.constant 0 : i32
    %c0_i32_0 = arith.constant 0 : i32
    %c0_i32_1 = arith.constant 0 : i32
    return %arg0, %c0_i32, %c0_i32_0 : i32, i32, i32
  }
  func.func @transform_2(%arg0: i32) -> (i32, i32) {
    %c0_i32 = arith.constant 0 : i32
    %c0_i32_0 = arith.constant 0 : i32
    %c0_i32_1 = arith.constant 0 : i32
    return %c0_i32, %c0_i32_0 : i32, i32
  }
  func.func @transform_3(%arg0: i32) -> (i32, i32, i32) {
    %c0_i32 = arith.constant 0 : i32
    %c0_i32_0 = arith.constant 0 : i32
    %c0_i32_1 = arith.constant 0 : i32
    return %arg0, %c0_i32, %c0_i32_0 : i32, i32, i32
  }
  func.func @transform_4(%arg0: i32) -> (i32, i32) {
    %c0_i32 = arith.constant 0 : i32
    %c0_i32_0 = arith.constant 0 : i32
    %c0_i32_1 = arith.constant 0 : i32
    return %c0_i32, %c0_i32_0 : i32, i32
  }
  func.func @transform_5(%arg0: i32) -> (i32, i32, i32) {
    %c0_i32 = arith.constant 0 : i32
    %c0_i32_0 = arith.constant 0 : i32
    %c0_i32_1 = arith.constant 0 : i32
    return %arg0, %c0_i32, %c0_i32_0 : i32, i32, i32
  }
  func.func @transform_6(%arg0: i32) -> (i32, i32) {
    %c0_i32 = arith.constant 0 : i32
    %c0_i32_0 = arith.constant 0 : i32
    %c0_i32_1 = arith.constant 0 : i32
    return %c0_i32, %c0_i32_0 : i32, i32
  }
  func.func @transform_7(%arg0: i32) -> (i32, i32, i32) {
    %c0_i32 = arith.constant 0 : i32
    %c0_i32_0 = arith.constant 0 : i32
    %c0_i32_1 = arith.constant 0 : i32
    return %arg0, %c0_i32, %c0_i32_0 : i32, i32, i32
  }
  func.func @transform_8(%arg0: i32) -> (i32, i32) {
    %c0_i32 = arith.constant 0 : i32
    %c0_i32_0 = arith.constant 0 : i32
    %c0_i32_1 = arith.constant 0 : i32
    return %c0_i32, %c0_i32_0 : i32, i32
  }
  func.func @transform_9(%arg0: i32) -> (i32, i32, i32) {
    %c0_i32 = arith.constant 0 : i32
    %c0_i32_0 = arith.constant 0 : i32
    %c0_i32_1 = arith.constant 0 : i32
    return %arg0, %c0_i32, %c0_i32_0 : i32, i32, i32
  }
  func.func @transform_10(%arg0: i32) -> (i32, i32, i32) {
    %c0_i32 = arith.constant 0 : i32
    %c0_i32_0 = arith.constant 0 : i32
    %c0_i32_1 = arith.constant 0 : i32
    return %arg0, %c0_i32, %c0_i32_0 : i32, i32, i32
  }
}

</mosaic_0001>

<bundles_post_ra>
// kernel: _lambda_.1
= control target key start
LH: loop header
LB: loop body
LE: loop exit
PB: predicated region body
PF: predicated region fallthrough
CT: control target
= control target key end

     0   :  { %s1171_s13 = smov 0   ;;  %s1360_s0 = inlined_call_operand.vmem [shape: f32[2,144,256], index: 0, kind: input, shape index: {}]   ;;  %s1361_s1 = inlined_call_operand.vmem [shape: f32[2,8,144], index: 1, kind: input, shape index: {}]   ;;  %s1362_s2 = inlined_call_operand.vmem [shape: f32[8,1], index: 2, kind: input, shape index: {}, may-alias: {2,4}]   ;;  %s1363_s3 = inlined_call_operand.vmem [shape: f32[2,8,72], index: 3, kind: input, shape index: {}]   ;;  %s1364_s4 = inlined_call_operand.vmem [shape: f32[8,1], index: 4, kind: input, shape index: {}, may-alias: {2,4}]   ;;  %s1365_s5 = inlined_call_operand.vmem [shape: f32[2,48,256], index: 5, kind: input, shape index: {}]   ;;  %s1366_s6 = inlined_call_operand.vmem [shape: f32[3,48], index: 6, kind: input, shape index: {}]   ;;  %s1367_s7 = inlined_call_operand.vmem [shape: f32[2,3,8], index: 7, kind: input, shape index: {}]   ;;  %s1368_s8 = inlined_call_operand.vmem [shape: f32[3,1], index: 8, kind: input, shape index: {}]   ;;  %s1369_s9 = inlined_call_operand.vmem [shape: f32[2,8,256], index: 9, kind: output, shape index: {0}]   ;;  %s1370_s10 = inlined_call_operand.vmem [shape: f32[2,3,256], index: 10, kind: output, shape index: {1}]  }
   0x1 LB: > { %s1021_s14 = sadd.s32 4294967295, %s1104_s13   ;;  %p1025_p0 = scmp.ge.s32.totalorder %s1104_s13, 1  ;;  %s1104_s13 = sphi %s1171_s13, %s21_s13  }
   0x2   : > { %p353_p1 = scmp.lt.s32.totalorder %s1104_s13, 3 }
   0x4   : > { %p354_p2 = pnand %p1025_p0, %p353_p1 }
   0x5   : > { %p414_p3 = scmp.lt.s32.totalorder (!%p354_p2), %s1021_s14, 1  ;;  %s1107_s25 = smov (!%p354_p2), 17  }
   0x6   : > { %357 = sbr.rel (%p354_p2) target bundleno = 757 (0x2f5), region = 56  ;;  %s1108_s26 = smov (!%p354_p2), 95  }
   0x7   : > { %s1109_s27 = smov (!%p354_p2), 94   ;;  %s1110_s28 = smov (!%p354_p2), 96  }
   0x8   : > { %s1111_s29 = smov (!%p354_p2), 110   ;;  %s1112_s30 = smov (!%p354_p2), 111  }
   0x9   : > { %s1113_s11 = smov (!%p354_p2), 112   ;;  %s1114_s12 = smov (!%p354_p2), 126  }
   0xb   : > { %s1380_s14 = smov (!%p414_p3, %s1021_s14), 1  ;;  %v1106_v14 = vmov 0   ;;  %v485_v17 = vld [vmem:[%s1362_s2] sm:$0xff]  ;;  %vm491_vm0 = vcmask 130048   ;;  %vm589_vm3 = vcmask 138240   ;;  %v596_v63 = vlaneseq }
   0xc   : > { %s1061_s15 = smul.u32 288, %s1380_s14  ;;  %1081 = vset.pattern.permute.xlu0 %v1106_v14  ;;  %1097 = vset.pattern.permute.xlu1 %v1106_v14  ;;  %s1058_s21 = sshll.u32 %s1380_s14, 4  ;;  %v708_v61 = vld [vmem:[%s1364_s4] sm:$0xff]  ;;  %vm667_vm4 = vcmask 769024   ;;  %vm702_vm7 = vcmask 777216   ;;  %vm654_vm8 = vcmask 785408  }
   0xd   : > { %488 = vperm.xlu0 %1081, %v485_v17   ;;  %s423_s24 = scalar_lea.vmem %s1361_s1, %s1058_s21  ;;  %vm641_vm10 = vcmask 900096   ;;  %vm691_vm11 = vcmask 908288   ;;  %vm628_vm12 = vcmask 916480   ;;  %vm615_vm13 = vcmask 1031168   ;;  %s441_s17 = scalar_lea.vmem %s1369_s9, %s1058_s21 }
   0xe   : > { %s1185_s18 = scalar_lea.vmem %s1360_s0, %s1061_s15  ;;  %v447_v34 = vld [vmem:[%s423_s24] sm:$0xff]  ;;  %v448_v39 = vld [vmem:[%s423_s24 + $0x8] sm:$0xff]  ;;  %s1115_s15 = smov 127   ;;  %vm680_vm15 = vcmask 1039360  }
   0xf   : > { %v479_v0 = vld [vmem:[%s1185_s18 + $0xf0] sm:$0xff]  ;;  %v480_v1 = vld [vmem:[%s1185_s18 + $0xf8] sm:$0xff]  ;;  %v477_v2 = vld [vmem:[%s1185_s18 + $0xe0] sm:$0xff] }
  0x10   : > { %495 = vmatpush.msra.mxu0 %v479_v0  ;;  %535 = vmatpush.msra.mxu2 %v480_v1  ;;  %v478_v3 = vld [vmem:[%s1185_s18 + $0xe8] sm:$0xff]  ;;  %v475_v4 = vld [vmem:[%s1185_s18 + $0xd0] sm:$0xff]  ;;  %v476_v5 = vld [vmem:[%s1185_s18 + $0xd8] sm:$0xff]  ;;  %v597_v1 = vand.u32 127, %v596_v63 }
  0x11   : > { %v473_v6 = vld [vmem:[%s1185_s18 + $0xc0] sm:$0xff]  ;;  %v474_v7 = vld [vmem:[%s1185_s18 + $0xc8] sm:$0xff]  ;;  %v471_v8 = vld [vmem:[%s1185_s18 + $0xb0] sm:$0xff] }
  0x12   : > { %496 = vmatpush.msra.mxu0 %v477_v2  ;;  %536 = vmatpush.msra.mxu2 %v478_v3  ;;  %v472_v9 = vld [vmem:[%s1185_s18 + $0xb8] sm:$0xff]  ;;  %v469_v10 = vld [vmem:[%s1185_s18 + $0xa0] sm:$0xff]  ;;  %v470_v11 = vld [vmem:[%s1185_s18 + $0xa8] sm:$0xff]  ;;  %v598_v2 = vadd.s32 128, %v597_v1 }
  0x13   : > { %v467_v12 = vld [vmem:[%s1185_s18 + $0x90] sm:$0xff]  ;;  %v468_v13 = vld [vmem:[%s1185_s18 + $0x98] sm:$0xff]  ;;  %v465_v15 = vld [vmem:[%s1185_s18 + $0x80] sm:$0xff] }
  0x14   : > { %497 = vmatpush.msra.mxu0 %v475_v4  ;;  %537 = vmatpush.msra.mxu2 %v476_v5  ;;  %v466_v16 = vld [vmem:[%s1185_s18 + $0x88] sm:$0xff]  ;;  %v463_v18 = vld [vmem:[%s1185_s18 + $0x70] sm:$0xff]  ;;  %v464_v19 = vld [vmem:[%s1185_s18 + $0x78] sm:$0xff]  ;;  %v599_v5 = vand.u32 15, %v597_v1 }
  0x15   : > { %v461_v20 = vld [vmem:[%s1185_s18 + $0x60] sm:$0xff]  ;;  %v462_v21 = vld [vmem:[%s1185_s18 + $0x68] sm:$0xff]  ;;  %v459_v22 = vld [vmem:[%s1185_s18 + $0x50] sm:$0xff] }
  0x16   : > { %498 = vmatpush.msra.mxu0 %v473_v6  ;;  %538 = vmatpush.msra.mxu2 %v474_v7  ;;  %v460_v23 = vld [vmem:[%s1185_s18 + $0x58] sm:$0xff]  ;;  %v457_v24 = vld [vmem:[%s1185_s18 + $0x40] sm:$0xff]  ;;  %v458_v25 = vld [vmem:[%s1185_s18 + $0x48] sm:$0xff]  ;;  %v600_v6 = vand.u32 15, %v598_v2  ;;  %vm1253_vm5 = vcmp.le.s32.totalorder %v599_v5, 14  ;;  %vm1280_vm14 = vcmp.ge.s32.totalorder %v599_v5, 1 }
  0x17   : > { %v455_v26 = vld [vmem:[%s1185_s18 + $0x30] sm:$0xff]  ;;  %v456_v27 = vld [vmem:[%s1185_s18 + $0x38] sm:$0xff]  ;;  %v453_v28 = vld [vmem:[%s1185_s18 + $0x20] sm:$0xff] }
  0x18   : > { %499 = vmatpush.msra.mxu0 %v471_v8  ;;  %539 = vmatpush.msra.mxu2 %v472_v9  ;;  %v454_v29 = vld [vmem:[%s1185_s18 + $0x28] sm:$0xff]  ;;  %v451_v30 = vld [vmem:[%s1185_s18 + $0x10] sm:$0xff]  ;;  %v452_v31 = vld [vmem:[%s1185_s18 + $0x18] sm:$0xff]  ;;  %vm1257_vm6 = vcmp.le.s32.totalorder %v600_v6, 14  ;;  %vm1265_vm9 = vcmp.ge.s32.totalorder %v600_v6, 1 }
  0x19   : > { %v449_v32 = vld [vmem:[%s1185_s18] sm:$0xff]  ;;  %v450_v33 = vld [vmem:[%s1185_s18 + $0x8] sm:$0xff]  ;;  %v483_v35 = vld [vmem:[%s1185_s18 + $0x110] sm:$0xff] }
  0x1a   : > { %500 = vmatpush.msra.mxu0 %v469_v10  ;;  %540 = vmatpush.msra.mxu2 %v470_v11  ;;  %v484_v36 = vld [vmem:[%s1185_s18 + $0x118] sm:$0xff]  ;;  %v481_v37 = vld [vmem:[%s1185_s18 + $0x100] sm:$0xff]  ;;  %v482_v38 = vld [vmem:[%s1185_s18 + $0x108] sm:$0xff]  ;;  %s1029_s18 = sshll.u32 %s1380_s14, 3 }
  0x1b   : > { %s427_s22 = scalar_lea.vmem %s1363_s3, %s1029_s18  ;;  %s446_s23 = scalar_lea.vmem %s1370_s10, %s1029_s18 }
  0x1c   : > { %501 = vmatpush.msra.mxu0 %v467_v12  ;;  %541 = vmatpush.msra.mxu2 %v468_v13 }
  0x1e   : > { %502 = vmatpush.msra.mxu0 %v465_v15  ;;  %542 = vmatpush.msra.mxu2 %v466_v16 }
  0x20   : > { %503 = vmatpush.msra.mxu0 %v463_v18  ;;  %543 = vmatpush.msra.mxu2 %v464_v19 }
  0x22   : > { %504 = vmatpush.msra.mxu0 %v461_v20  ;;  %544 = vmatpush.msra.mxu2 %v462_v21 }
  0x24   : > { %505 = vmatpush.msra.mxu0 %v459_v22  ;;  %545 = vmatpush.msra.mxu2 %v460_v23 }
  0x26   : > { %506 = vmatpush.msra.mxu0 %v457_v24  ;;  %546 = vmatpush.msra.mxu2 %v458_v25 }
  0x28   : > { %507 = vmatpush.msra.mxu0 %v455_v26  ;;  %547 = vmatpush.msra.mxu2 %v456_v27 }
  0x2a   : > { %508 = vmatpush.msra.mxu0 %v453_v28  ;;  %548 = vmatpush.msra.mxu2 %v454_v29 }
  0x2c   : > { %509 = vmatpush.msra.mxu0 %v451_v30  ;;  %549 = vmatpush.msra.mxu2 %v452_v31 }
  0x2e   : > { %510 = vmatpush.msra.mxu0 %v449_v32  ;;  %550 = vmatpush.msra.mxu2 %v450_v33 }
  0x2f   : > { %511 = vmatmul.f32.vlgmr.msra.gmra.mxu0 %v447_v34  ;;  %551 = vmatmul.f32.vlgmr.msra.gmra.mxu2 %v447_v34 }
  0x30   : > { %529 = vmatpush.msrb.mxu0 %v483_v35  ;;  %569 = vmatpush.msrb.mxu2 %v484_v36 }
  0x32   : > { %530 = vmatpush.msrb.mxu0 %v481_v37  ;;  %570 = vmatpush.msrb.mxu2 %v482_v38 }
  0x37   : > { %1036 = vmatmul.msk.f32.vlgmr.msrb.gmra.mxu0 %vm491_vm0, %v448_v39  ;;  %1037 = vmatmul.msk.f32.vlgmr.msrb.gmra.mxu2 %vm491_vm0, %v448_v39  ;;  %vm714_vm0 = vcmask 588800  }
  0x7f   : > { %v489_v41 = vpop.permute.xlu0 %488 }
  0xac   : > { %v512_v40 = vpop.f32.mrf.mxu0 }
  0xad   : > { %v513_v42 = vadd.f32 %v512_v40, %v489_v41  ;;  %v707_v40 = vld [vmem:[%s427_s22] sm:$0xff] }
  0xb2   : > { %v552_v43 = vpop.f32.mrf.mxu2 }
  0xb3   : > { %v553_v47 = vadd.f32 %v552_v43, %v489_v41 }
  0xb4   : > { %v532_v44 = vpop.f32.mrf.mxu0 }
  0xb5   : > { %v533_v45 = vadd.f32 %v532_v44, %v513_v42 }
  0xb7   : > { %vm575_vm1 = vcmp.ge.f32.partialorder %v533_v45, 0.0  ;;  %v577_v46 = vmul.f32 0.2, %v533_v45 }
  0xb9   : > { %v579_v48 = vsel %vm575_vm1, %v533_v45, %v577_v46 }
  0xba   : > { %v572_v49 = vpop.f32.mrf.mxu2  ;;  %v581_v50 = vmul.f32 1.4142135, %v579_v48 }
  0xbb   : > { %v573_v51 = vadd.f32 %v572_v49, %v553_v47 }
  0xbc   : > { %585 = vrot.lane.b32.xlu0 %v581_v50, %s1107_s25 }
  0xbd   : > { %v578_v52 = vmul.f32 0.2, %v573_v51  ;;  %vm576_vm2 = vcmp.ge.f32.partialorder %v573_v51, 0.0 }
  0xbf   : > { %v580_v53 = vsel %vm576_vm2, %v573_v51, %v578_v52  ;;  %v870_v51 = vld [vmem:[%s1368_s8] sm:$0x7]  ;;  %vm782_vm2 = vcmask 64512  }
  0xc0   : > { %v582_v54 = vmul.f32 1.4142135, %v580_v53 }
  0xc2   : > { %587 = vrot.lane.b32.xlu1 %v582_v54, %s1107_s25  ;;  %s1062_s25 = smul.u32 96, %s1380_s14 }
 0x12e   : > { %v586_v55 = vpop.permute.xlu0 %585 }
 0x12f   : > { %v1232_v56 = vsel %vm589_vm3, 0.0, %v586_v55 }
 0x130   : > { %696 = vrot.lane.b32.xlu2 %v1232_v56, %s1108_s26  ;;  %661 = vrot.lane.b32.xlu0 %v1232_v56, %s1109_s27 }
 0x134   : > { %v588_v57 = vpop.permute.xlu1 %587 }
 0x135   : > { %v1236_v58 = vsel %vm589_vm3, %v586_v55, %v588_v57  ;;  %v595_v59 = vsel %vm589_vm3, %v588_v57, 0.0 }
 0x136   : > { %663 = vrot.lane.b32.xlu1 %v1236_v58, %s1109_s27  ;;  %v1082_v60 = vpack.i.bf16 %v595_v59, %v1236_v58 }
 0x138   : > { %665 = vrot.lane.b32.xlu2 %v595_v59, %s1109_s27  ;;  %650 = vrot.lane.b32.xlu0 %v1236_v58, %s1110_s28 }
 0x13e   : > { %652 = vrot.lane.b32.xlu1 %v595_v59, %s1110_s28 }
 0x140   : > { %639 = vrot.lane.b32.xlu0 %v595_v59, %s1111_s29  ;;  %1083 = vrot.lane.b32.xlu2 %v1082_v60, %s1108_s26  ;;  %s1031_s26 = sshll.u32 %s1380_s14, 2 }
 0x146   : > { %1088 = vrot.lane.b32.xlu1 %v1082_v60, %s1112_s30 }
 0x148   : > { %626 = vrot.lane.b32.xlu0 %v595_v59, %s1113_s11  ;;  %637 = vrot.lane.b32.xlu2 %v1236_v58, %s1111_s29 }
 0x14e   : > { %611 = vrot.lane.b32.xlu1 %v1236_v58, %s1114_s12 }
 0x150   : > { %648 = vrot.lane.b32.xlu0 %v1232_v56, %s1110_s28  ;;  %624 = vrot.lane.b32.xlu2 %v1236_v58, %s1113_s11 }
 0x156   : > { %1093 = vrot.lane.b32.xlu1 %v1082_v60, %s1115_s15 }
 0x158   : > { %622 = vrot.lane.b32.xlu0 %v1232_v56, %s1113_s11  ;;  %613 = vrot.lane.b32.xlu2 %v595_v59, %s1114_s12 }
 0x15e   : > { %635 = vrot.lane.b32.xlu1 %v1232_v56, %s1111_s29  ;;  %s1323_s29 = scalar_lea.vmem %s1365_s5, %s1062_s25 }
 0x15f   : > { %v778_v60 = vld [vmem:[%s1323_s29 + $0x48] sm:$0xff]  ;;  %v772_v2 = vld [vmem:[%s1323_s29 + $0x18] sm:$0xff]  ;;  %v779_v5 = vld [vmem:[%s1323_s29 + $0x50] sm:$0xff] }
 0x160   : > { %711 = vperm.xlu0 %1081, %v708_v61   ;;  %685 = vrot.lane.b32.xlu2 %v1232_v56, %s1112_s30  ;;  %v770_v6 = vld [vmem:[%s1323_s29 + $0x8] sm:$0xff]  ;;  %v775_v9 = vld [vmem:[%s1323_s29 + $0x30] sm:$0xff]  ;;  %v773_v10 = vld [vmem:[%s1323_s29 + $0x20] sm:$0xff] }
 0x166   : > { %609 = vrot.lane.b32.xlu1 %v1232_v56, %s1114_s12  ;;  %s436_s12 = scalar_lea.vmem %s1367_s7, %s1031_s26 }
 0x167   : > { %v781_v59 = vld [vmem:[%s436_s12] sm:$0x7] }
 0x168   : > { %674 = vrot.lane.b32.xlu2 %v1232_v56, %s1115_s15 }
 0x16e   : > { %873 = vperm.xlu1 %1097, %v870_v51  }
 0x18a   : > { %v697_v62 = vpop.permute.xlu2 %696 }
 0x192   : > { %v666_v0 = vpop.permute.xlu2 %665 }
 0x19a   : > { %v1084_v3 = vpop.permute.xlu2 %1083 }
 0x19b   : > { %v1086_v7 = vunpack.i.h.bf16 %v1084_v3  ;;  %v1085_v8 = vunpack.i.l.bf16 %v1084_v3 }
 0x19d   : > { %v703_v15 = vsel %vm702_vm7, %v697_v62, %v1085_v8  ;;  %v704_v16 = vsel %vm702_vm7, %v1085_v8, %v1086_v7  ;;  %v776_v62 = vld [vmem:[%s1323_s29 + $0x38] sm:$0xff]  ;;  %v768_v7 = vld [vmem:[%s1366_s6] sm:$0x7] }
 0x19e   : > { %v777_v8 = vld [vmem:[%s1323_s29 + $0x40] sm:$0xff] }
 0x1a2   : > { %v662_v4 = vpop.permute.xlu0 %661  ;;  %v638_v17 = vpop.permute.xlu2 %637 }
 0x1a8   : > { %v664_v11 = vpop.permute.xlu1 %663 }
 0x1a9   : > { %v668_v12 = vsel %vm667_vm4, %v662_v4, %v664_v11  ;;  %v669_v13 = vsel %vm667_vm4, %v664_v11, %v666_v0  ;;  %v774_v0 = vld [vmem:[%s1323_s29 + $0x28] sm:$0xff]  ;;  %vm826_vm4 = vcmask 392192   ;;  %v771_v11 = vld [vmem:[%s1323_s29 + $0x10] sm:$0xff] }
 0x1aa   : > { %v651_v14 = vpop.permute.xlu0 %650  ;;  %1038 = vmatpush.msk.msra.mxu1 %vm1253_vm5, %v668_v12  ;;  %1045 = vmatpush.msk.msra.mxu3 %vm1257_vm6, %v669_v13  ;;  %v625_v23 = vpop.permute.xlu2 %624  ;;  %v769_v12 = vld [vmem:[%s1323_s29] sm:$0xff] }
 0x1ac   : > { %726 = vmatpush.msra.mxu1 %v703_v15  ;;  %746 = vmatpush.msra.mxu3 %v704_v16 }
 0x1b0   : > { %v653_v19 = vpop.permute.xlu1 %652 }
 0x1b1   : > { %v656_v20 = vsel %vm654_vm8, %v651_v14, %v653_v19 }
 0x1b2   : > { %v640_v21 = vpop.permute.xlu0 %639  ;;  %1046 = vmatpush.msk.msra.mxu3 %vm1265_vm9, %v656_v20  ;;  %v614_v30 = vpop.permute.xlu2 %613 }
 0x1b3   : > { %v643_v22 = vsel %vm641_vm10, %v638_v17, %v640_v21 }
 0x1b4   : > { %1047 = vmatpush.msk.msra.mxu3 %vm1257_vm6, %v643_v22 }
 0x1b8   : > { %v1089_v24 = vpop.permute.xlu1 %1088 }
 0x1b9   : > { %v1091_v25 = vunpack.i.h.bf16 %v1089_v24  ;;  %v1090_v26 = vunpack.i.l.bf16 %v1089_v24 }
 0x1ba   : > { %v627_v27 = vpop.permute.xlu0 %626  ;;  %v686_v41 = vpop.permute.xlu2 %685 }
 0x1bb   : > { %v693_v28 = vsel %vm691_vm11, %v1090_v26, %v1091_v25  ;;  %v630_v29 = vsel %vm628_vm12, %v625_v23, %v627_v27  ;;  %v692_v45 = vsel %vm691_vm11, %v686_v41, %v1090_v26 }
 0x1bc   : > { %749 = vmatpush.msra.mxu3 %v693_v28 }
 0x1be   : > { %1048 = vmatpush.msk.msra.mxu3 %vm1265_vm9, %v630_v29 }
 0x1c0   : > { %v612_v31 = vpop.permute.xlu1 %611 }
 0x1c1   : > { %v617_v32 = vsel %vm615_vm13, %v612_v31, %v614_v30 }
 0x1c2   : > { %v649_v34 = vpop.permute.xlu0 %648  ;;  %1049 = vmatpush.msk.msra.mxu3 %vm1257_vm6, %v617_v32  ;;  %v675_v49 = vpop.permute.xlu2 %674 }
 0x1c3   : > { %v655_v35 = vsel %vm654_vm8, %v649_v34, %v651_v14 }
 0x1c4   : > { %1039 = vmatpush.msk.msra.mxu1 %vm1280_vm14, %v655_v35 }
 0x1c8   : > { %v1094_v36 = vpop.permute.xlu1 %1093 }
 0x1c9   : > { %v1096_v37 = vunpack.i.h.bf16 %v1094_v36  ;;  %v1095_v38 = vunpack.i.l.bf16 %v1094_v36 }
 0x1ca   : > { %v623_v44 = vpop.permute.xlu0 %622 }
 0x1cb   : > { %v682_v39 = vsel %vm680_vm15, %v1095_v38, %v1096_v37  ;;  %v629_v46 = vsel %vm628_vm12, %v623_v44, %v625_v23  ;;  %v681_v50 = vsel %vm680_vm15, %v675_v49, %v1095_v38 }
 0x1cc   : > { %752 = vmatpush.msra.mxu3 %v682_v39 }
 0x1ce   : > { %1050 = vmatpush.msk.msra.mxu3 %vm1265_vm9, %v1236_v58  ;;  %v780_v58 = vld [vmem:[%s1323_s29 + $0x58] sm:$0xff] }
 0x1cf   : > { %1051 = vmatmul.msk.f32.vlgmr.msra.gmra.mxu3 %vm714_vm0, %v707_v40 }
 0x1d0   : > { %v636_v42 = vpop.permute.xlu1 %635 }
 0x1d1   : > { %v642_v43 = vsel %vm641_vm10, %v636_v42, %v638_v17 }
 0x1d2   : > { %1040 = vmatpush.msk.msra.mxu1 %vm1253_vm5, %v642_v43  ;;  %v712_v52 = vpop.permute.xlu0 %711 }
 0x1d4   : > { %729 = vmatpush.msra.mxu1 %v692_v45 }
 0x1d6   : > { %1041 = vmatpush.msk.msra.mxu1 %vm1280_vm14, %v629_v46 }
 0x1d8   : > { %v610_v47 = vpop.permute.xlu1 %609 }
 0x1d9   : > { %v616_v48 = vsel %vm615_vm13, %v610_v47, %v612_v31 }
 0x1da   : > { %1042 = vmatpush.msk.msra.mxu1 %vm1253_vm5, %v616_v48  ;;  %vm881_vm5 = vcmask 1043456  }
 0x1dc   : > { %732 = vmatpush.msra.mxu1 %v681_v50 }
 0x1de   : > { %1043 = vmatpush.msk.msra.mxu1 %vm1280_vm14, %v1232_v56 }
 0x1df   : > { %1044 = vmatmul.msk.f32.vlgmr.msra.gmra.mxu1 %vm714_vm0, %v707_v40 }
 0x1e0   : > { %v874_v16 = vpop.permute.xlu1 %873 }
 0x252   : > { %v755_v53 = vpop.f32.mrf.mxu3 }
 0x253   : > { %v756_v54 = vadd.f32 %v755_v53, %v712_v52 }
 0x255   : > { %v761_v55 = vmul.f32 0.2, %v756_v54  ;;  %vm759_vm1 = vcmp.ge.f32.partialorder %v756_v54, 0.0 }
 0x257   : > { %v763_v56 = vsel %vm759_vm1, %v756_v54, %v761_v55 }
 0x258   : > { %v765_v57 = vmul.f32 1.4142135, %v763_v56 }
 0x25a   : > { %767 = vst [vmem:[%s441_s17 + $0x8] sm:$0xff] %v765_v57  ;;  %821 = vmatpush.msrb.mxu3 %v765_v57 }
 0x25b   : > { %1053 = vmatmul.msk.f32.vlgmr.msrb.gmra.mxu3 %vm782_vm2, %v781_v59 }
 0x25c   : > { %860 = vmatpush.msra.mxu3 %v780_v58  ;;  %v735_v61 = vpop.f32.mrf.mxu1 }
 0x25d   : > { %v736_v63 = vadd.f32 %v735_v61, %v712_v52 }
 0x25e   : > { %861 = vmatpush.msra.mxu3 %v778_v60 }
 0x25f   : > { %v760_v1 = vmul.f32 0.2, %v736_v63  ;;  %vm758_vm3 = vcmp.ge.f32.partialorder %v736_v63, 0.0 }
 0x260   : > { %862 = vmatpush.msra.mxu3 %v776_v62 }
 0x261   : > { %v762_v3 = vsel %vm758_vm3, %v736_v63, %v760_v1 }
 0x262   : > { %863 = vmatpush.msra.mxu3 %v774_v0  ;;  %v764_v4 = vmul.f32 1.4142135, %v762_v3 }
 0x264   : > { %864 = vmatpush.msra.mxu3 %v772_v2  ;;  %766 = vst [vmem:[%s441_s17] sm:$0xff] %v764_v4  ;;  %801 = vmatpush.msrb.mxu1 %v764_v4 }
 0x265   : > { %1052 = vmatmul.msk.f32.vlgmr.msrb.gmra.mxu1 %vm782_vm2, %v781_v59 }
 0x266   : > { %840 = vmatpush.msra.mxu1 %v779_v5  ;;  %865 = vmatpush.msra.mxu3 %v770_v6 }
 0x267   : > { %1055 = vmatmul.msk.f32.vlgmr.msra.gmra.mxu3 %vm826_vm4, %v768_v7 }
 0x268   : > { %841 = vmatpush.msra.mxu1 %v777_v8 }
 0x26a   : > { %842 = vmatpush.msra.mxu1 %v775_v9 }
 0x26c   : > { %843 = vmatpush.msra.mxu1 %v773_v10 }
 0x26e   : > { %844 = vmatpush.msra.mxu1 %v771_v11 }
 0x270   : > { %845 = vmatpush.msra.mxu1 %v769_v12 }
 0x271   : > { %1054 = vmatmul.msk.f32.vlgmr.msra.gmra.mxu1 %vm826_vm4, %v768_v7 }
 0x2de   : > { %v823_v13 = vpop.f32.mrf.mxu3 }
 0x2e2   : > { %v803_v14 = vpop.f32.mrf.mxu1 }
 0x2ea   : > { %v867_v15 = vpop.f32.mrf.mxu3 }
 0x2eb   : > { %v868_v17 = vadd.f32 %v867_v15, %v823_v13 }
 0x2ed   : > { %v877_v18 = vadd.f32 %v874_v16, %v868_v17 }
 0x2ee   : > { %v847_v19 = vpop.f32.mrf.mxu1 }
 0x2ef   : > { %v848_v20 = vadd.f32 %v847_v19, %v803_v14  ;;  %v880_v21 = vrot.slane %v877_v18, 4 }
 0x2f1   : > { %v876_v22 = vadd.f32 %v874_v16, %v848_v20 }
 0x2f3   : > { %v882_v23 = vsel %vm881_vm5, %v876_v22, %v880_v21 }
 0x2f4   : > { %884 = vst [vmem:[%s446_s23] sm:$0x77] %v882_v23 }
 0x2f5 PF: > { %s21_s13 = sadd.s32 1, %s1104_s13  }
 0x2f6   : > { %p18_p4 = scmp.ge.s32.totalorder %s21_s13, 4  }
 0x2f8   :  { %20 = sbr.rel (!%p18_p4) target bundleno = 1 (0x1), region = 110 }

</bundles_post_ra>
